<compile_context>
chip_gen: v5e
topology: v5e:2x2
jax: 0.10.0
libtpu: 0.0.40
codegen_flags: <defaults>
</compile_context>

<pallas_src>
import jax
import jax.numpy as jnp
from jax import lax
from jax.experimental import pallas as pl
from jax.experimental.pallas import tpu as pltpu

THRESHOLD = 0.2                 # module __init__ arg (static)
APPLY_CLASS_BALANCING = True    # module __init__ arg (static)


def _make_kernel(threshold: float, batch: int, tile_b: int, needs_row_mask: bool):
    inv_threshold = (1.0 / float(threshold)) if threshold > 0.0 else float("inf")

    def kernel(weak_ref, strong_ref, out_ref):
        weak = weak_ref[...].astype(jnp.float32)      # (TB, C)
        strong = strong_ref[...].astype(jnp.float32)  # (TB, C)
        tb, c = weak.shape

        col = lax.broadcasted_iota(jnp.int32, (tb, c), 1)

        # ---- softmax(weak): max prob == 1/sum(exp(w - max)); argmax = first max idx
        wmax = jnp.max(weak, axis=1, keepdims=True)                  # (TB, 1)
        wsum = jnp.sum(jnp.exp(weak - wmax), axis=1, keepdims=True)  # (TB, 1)
        conf = wsum < inv_threshold                                  # == (max_prob > threshold)

        is_max = weak == wmax
        target = jnp.min(jnp.where(is_max, col, c), axis=1, keepdims=True)  # (TB, 1)
        onehot = (col == target).astype(jnp.float32)                 # (TB, C)

        # ---- per-row cross-entropy on strong logits
        smax = jnp.max(strong, axis=1, keepdims=True)
        lse = jnp.log(jnp.sum(jnp.exp(strong - smax), axis=1, keepdims=True)) + smax
        picked = jnp.sum(onehot * strong, axis=1, keepdims=True)
        ce = lse - picked                                            # (TB, 1)

        if needs_row_mask:
            # Only emitted when B % TB != 0 (padded rows in the last block).
            row = lax.broadcasted_iota(jnp.int32, (tb, 1), 0) + pl.program_id(0) * tile_b
            valid = row < batch
            # Keep this order: zero ce BEFORE multiplying so no 0*NaN/Inf path.
            ce = jnp.where(valid, ce, 0.0)
            maskf = jnp.logical_and(conf, valid).astype(jnp.float32)
        else:
            maskf = conf.astype(jnp.float32)
        mce = maskf * ce                                             # (TB, 1)

        # ---- ONE fused per-class scatter on the MXU: [maskf | mce]^T @ onehot
        stacked = jnp.concatenate([maskf, mce], axis=1)              # (TB, 2)
        dims = (((0,), (0,)), ((), ()))
        partial = lax.dot_general(stacked, onehot, dims,
                                  preferred_element_type=jnp.float32)  # (2, C)
        out_ref[...] = partial[None, :, :]                           # (1, 2, C) block

    return kernel


def _vmem_plan():
    """Per-generation pipeline budget and explicit scoped-VMEM limit."""
    try:
        physical = int(pltpu.get_tpu_info().vmem_capacity_bytes)
    except Exception:
        physical = 64 * 1024 * 1024   # conservative fallback (v7x per-TC physical)
    # v5e/v6e (128 MiB physical): 24 MiB of pipeline buffers, 32 MiB scoped limit.
    # v7x (64 MiB physical): ~21 MiB of pipeline buffers, ~29 MiB scoped limit.
    pipeline = max(12 * 1024 * 1024, min(24 * 1024 * 1024, physical // 3))
    limit = int(min(physical // 2, pipeline + 8 * 1024 * 1024))
    return pipeline, limit


def _choose_tile_b(batch: int, c: int, itemsize: int, budget: int, tb=None) -> int:
    """Batch tile sized by bytes: 2 inputs x 2 pipeline buffers of (TB, C) plus
    ~6 f32 in-kernel temporaries per row must fit the pipeline budget."""
    if tb is None:
        bytes_per_row = 4 * c * itemsize + 24 * c
        tb = budget // max(1, bytes_per_row)
        tb = max(8, min(32768, (tb // 8) * 8))
    if batch <= tb:
        return batch                    # single block == full batch dim (always legal)
    if tb % 8 != 0:
        raise ValueError("tb must be a multiple of 8 when it tiles the batch")
    return tb


def confidence_based_ce(anchors_weak, anchors_strong,
                        threshold=THRESHOLD,
                        apply_class_balancing=APPLY_CLASS_BALANCING,
                        tb=None):
    """anchors_weak, anchors_strong: (B, C) logits (f32 or bf16). Returns scalar f32 loss.

    If the logits already exist as bf16 upstream, pass them as bf16 (the kernel
    upcasts to f32 internally) — do not insert a wrapper-side downcast."""
    assert anchors_weak.shape == anchors_strong.shape
    B, C = anchors_weak.shape
    itemsize = max(jnp.dtype(anchors_weak.dtype).itemsize,
                   jnp.dtype(anchors_strong.dtype).itemsize)
    budget, vmem_limit = _vmem_plan()
    TB = _choose_tile_b(B, C, itemsize, budget, tb)
    nb = pl.cdiv(B, TB)
    needs_row_mask = (B % TB) != 0
    kernel = _make_kernel(float(threshold), B, TB, needs_row_mask)

    grid_spec = pltpu.PrefetchScalarGridSpec(
        num_scalar_prefetch=0,
        grid=(nb,),
        in_specs=[pl.BlockSpec((TB, C), lambda i: (i, 0)),
                  pl.BlockSpec((TB, C), lambda i: (i, 0))],
        out_specs=pl.BlockSpec((1, 2, C), lambda i: (i, 0, 0)),
    )
    partials = pl.pallas_call(
        kernel,
        grid_spec=grid_spec,
        out_shape=jax.ShapeDtypeStruct((nb, 2, C), jnp.float32),
        compiler_params=pltpu.CompilerParams(
            dimension_semantics=("parallel",),
            vmem_limit_bytes=vmem_limit),
    )(anchors_weak, anchors_strong)

    # ---- tiny finalize in plain JAX (sum over blocks, per-class divide)
    counts = jnp.sum(partials[:, 0, :], axis=0)   # (C,) masked count per class
    sums = jnp.sum(partials[:, 1, :], axis=0)     # (C,) masked CE sum per class
    # TODO(synk): PyTorch raises ValueError when the confidence mask is all zeros;
    # a data-dependent exception cannot be raised here (loss becomes NaN instead).
    if apply_class_balancing:
        present = counts > 0.0
        per_class = jnp.where(present, sums / jnp.where(present, counts, 1.0), 0.0)
        loss = jnp.sum(per_class) / jnp.sum(present.astype(jnp.float32))
    else:
        loss = jnp.sum(sums) / jnp.sum(counts)
    return loss


def _reference(anchors_weak, anchors_strong, threshold, apply_class_balancing):
    """Plain-JAX reference mirroring the PyTorch semantics."""
    probs = jax.nn.softmax(anchors_weak, axis=1)
    max_prob = jnp.max(probs, axis=1)
    target = jnp.argmax(probs, axis=1)
    mask = max_prob > threshold
    maskf = mask.astype(jnp.float32)
    n = jnp.sum(maskf)
    B, C = anchors_weak.shape
    logp = jax.nn.log_softmax(anchors_strong, axis=1)
    ce = -logp[jnp.arange(B), target]
    if apply_class_balancing:
        onehot = jax.nn.one_hot(target, C)
        counts = jnp.sum(maskf[:, None] * onehot, axis=0)
        class_w = jnp.where(counts > 0, n / jnp.where(counts > 0, counts, 1.0), 1.0)
        row_w = class_w[target]
        return jnp.sum(maskf * row_w * ce) / jnp.sum(maskf * row_w)
    return jnp.sum(maskf * ce) / n


if __name__ == "__main__":
    key = jax.random.PRNGKey(0)
    k1, k2 = jax.random.split(key)
    B, C = 50, 10
    # scale logits so plenty of rows clear the confidence threshold
    anchors_weak = 2.0 * jax.random.normal(k1, (B, C), dtype=jnp.float32)
    anchors_strong = jax.random.normal(k2, (B, C), dtype=jnp.float32)

    # multi-tile path with a partial final tile (grid = 4, TB = 16)
    loss = jax.block_until_ready(confidence_based_ce(anchors_weak, anchors_strong, tb=16))
    ref = _reference(anchors_weak, anchors_strong, THRESHOLD, True)
    assert jnp.allclose(loss, ref, rtol=1e-5, atol=1e-5), (loss, ref)

    # single-block path (default byte-sized tile, B multiple of 8 -> no row mask)
    aw64 = 2.0 * jax.random.normal(k1, (64, C), dtype=jnp.float32)
    as64 = jax.random.normal(k2, (64, C), dtype=jnp.float32)
    loss64 = jax.block_until_ready(confidence_based_ce(aw64, as64))
    ref64 = _reference(aw64, as64, THRESHOLD, True)
    assert jnp.allclose(loss64, ref64, rtol=1e-5, atol=1e-5), (loss64, ref64)

    # unweighted (no class balancing) path
    loss_u = jax.block_until_ready(
        confidence_based_ce(anchors_weak, anchors_strong, apply_class_balancing=False, tb=16))
    ref_u = _reference(anchors_weak, anchors_strong, THRESHOLD, False)
    assert jnp.allclose(loss_u, ref_u, rtol=1e-5, atol=1e-5), (loss_u, ref_u)

    print("KERNEL_OK")
</pallas_src>

<mosaic_0001>
module attributes {stable_mosaic.version = 11 : i64} {
  func.func @kernel(%arg0: i32, %arg1: memref<16x10xf32, #tpu.memory_space<vmem>>, %arg2: memref<16x10xf32, #tpu.memory_space<vmem>>, %arg3: memref<1x2x10xf32, #tpu.memory_space<vmem>>) attributes {dimension_semantics = [#tpu.dimension_semantics<parallel>], iteration_bounds = array<i64: 4>, scalar_prefetch = 0 : i64, scratch_operands = 0 : i64, tpu.core_type = #tpu.core_type<tc>, window_params = [{transform_indices = @transform_0, window_bounds = array<i64: 16, 10>}, {transform_indices = @transform_1, window_bounds = array<i64: 16, 10>}, {transform_indices = @transform_2, window_bounds = array<i64: 1, 2, 10>}]} {
    %c0 = arith.constant 0 : index
    %c0_0 = arith.constant 0 : index
    %0 = vector.load %arg1[%c0, %c0_0] : memref<16x10xf32, #tpu.memory_space<vmem>>, vector<16x10xf32>
    %c0_1 = arith.constant 0 : index
    %c0_2 = arith.constant 0 : index
    %1 = vector.load %arg2[%c0_1, %c0_2] : memref<16x10xf32, #tpu.memory_space<vmem>>, vector<16x10xf32>
    %2 = tpu.iota {dimensions = array<i32: 1>} : vector<16x10xi32>
    %cst = arith.constant dense<0xFF800000> : vector<16xf32>
    %3 = vector.multi_reduction <maximumf>, %0, %cst [1] : vector<16x10xf32> to vector<16xf32>
    %4 = vector.shape_cast %3 : vector<16xf32> to vector<16x1xf32>
    %5 = vector.broadcast %4 : vector<16x1xf32> to vector<16x10xf32>
    %6 = arith.subf %0, %5 : vector<16x10xf32>
    %7 = math.exp %6 : vector<16x10xf32>
    %cst_3 = arith.constant dense<0.000000e+00> : vector<16xf32>
    %8 = vector.multi_reduction <add>, %7, %cst_3 [1] : vector<16x10xf32> to vector<16xf32>
    %9 = vector.shape_cast %8 : vector<16xf32> to vector<16x1xf32>
    %cst_4 = arith.constant 5.000000e+00 : f32
    %10 = vector.broadcast %cst_4 : f32 to vector<16x1xf32>
    %11 = arith.cmpf olt, %9, %10 : vector<16x1xf32>
    %12 = vector.broadcast %4 : vector<16x1xf32> to vector<16x10xf32>
    %13 = arith.cmpf oeq, %0, %12 : vector<16x10xf32>
    %c10_i32 = arith.constant 10 : i32
    %14 = vector.broadcast %c10_i32 : i32 to vector<16x10xi32>
    %15 = arith.select %13, %2, %14 : vector<16x10xi1>, vector<16x10xi32>
    %cst_5 = arith.constant dense<2147483647> : vector<16xi32>
    %16 = vector.multi_reduction <minsi>, %15, %cst_5 [1] : vector<16x10xi32> to vector<16xi32>
    %17 = vector.shape_cast %16 : vector<16xi32> to vector<16x1xi32>
    %18 = vector.broadcast %17 : vector<16x1xi32> to vector<16x10xi32>
    %19 = arith.cmpi eq, %2, %18 : vector<16x10xi32>
    %20 = arith.extui %19 : vector<16x10xi1> to vector<16x10xi32>
    %21 = arith.sitofp %20 : vector<16x10xi32> to vector<16x10xf32>
    %cst_6 = arith.constant dense<0xFF800000> : vector<16xf32>
    %22 = vector.multi_reduction <maximumf>, %1, %cst_6 [1] : vector<16x10xf32> to vector<16xf32>
    %23 = vector.shape_cast %22 : vector<16xf32> to vector<16x1xf32>
    %24 = vector.broadcast %23 : vector<16x1xf32> to vector<16x10xf32>
    %25 = arith.subf %1, %24 : vector<16x10xf32>
    %26 = math.exp %25 : vector<16x10xf32>
    %cst_7 = arith.constant dense<0.000000e+00> : vector<16xf32>
    %27 = vector.multi_reduction <add>, %26, %cst_7 [1] : vector<16x10xf32> to vector<16xf32>
    %28 = vector.shape_cast %27 : vector<16xf32> to vector<16x1xf32>
    %29 = math.log %28 : vector<16x1xf32>
    %30 = arith.addf %29, %23 : vector<16x1xf32>
    %31 = arith.mulf %21, %1 : vector<16x10xf32>
    %cst_8 = arith.constant dense<0.000000e+00> : vector<16xf32>
    %32 = vector.multi_reduction <add>, %31, %cst_8 [1] : vector<16x10xf32> to vector<16xf32>
    %33 = vector.shape_cast %32 : vector<16xf32> to vector<16x1xf32>
    %34 = arith.subf %30, %33 : vector<16x1xf32>
    %35 = tpu.iota {dimensions = array<i32: 0>} : vector<16x1xi32>
    %c16_i32 = arith.constant 16 : i32
    %36 = arith.muli %arg0, %c16_i32 : i32
    %37 = vector.broadcast %36 : i32 to vector<16x1xi32>
    %38 = arith.addi %35, %37 : vector<16x1xi32>
    %c50_i32 = arith.constant 50 : i32
    %39 = vector.broadcast %c50_i32 : i32 to vector<16x1xi32>
    %40 = arith.cmpi slt, %38, %39 : vector<16x1xi32>
    %cst_9 = arith.constant 0.000000e+00 : f32
    %41 = vector.broadcast %cst_9 : f32 to vector<16x1xf32>
    %42 = arith.select %40, %34, %41 : vector<16x1xi1>, vector<16x1xf32>
    %43 = arith.andi %11, %40 : vector<16x1xi1>
    %44 = arith.extui %43 : vector<16x1xi1> to vector<16x1xi32>
    %45 = arith.sitofp %44 : vector<16x1xi32> to vector<16x1xf32>
    %46 = arith.mulf %45, %42 : vector<16x1xf32>
    %47 = tpu.concatenate %45, %46 in 1 : vector<16x1xf32>, vector<16x1xf32> -> vector<16x2xf32>
    %cst_10 = arith.constant dense<0.000000e+00> : vector<2x10xf32>
    %48 = tpu.matmul %47, %21, %cst_10 {dimension_numbers = #tpu.dot_dimension_numbers<[0], [0], [1], [1], [0, 1, 1, 1], [], []>} : vector<16x2xf32>, vector<16x10xf32>, vector<2x10xf32> -> vector<2x10xf32>
    %49 = vector.shape_cast %48 : vector<2x10xf32> to vector<1x2x10xf32>
    %c0_11 = arith.constant 0 : index
    %c0_12 = arith.constant 0 : index
    %c0_13 = arith.constant 0 : index
    %50 = vector.load %arg3[%c0_11, %c0_12, %c0_13] : memref<1x2x10xf32, #tpu.memory_space<vmem>>, vector<1x2x10xf32>
    tpu.vector_store %arg3[%c0_11, %c0_12, %c0_13], %49 {strides = array<i32>} : memref<1x2x10xf32, #tpu.memory_space<vmem>>, vector<1x2x10xf32>,
    return
  }
  func.func @transform_0(%arg0: i32) -> (i32, i32) {
    %c0_i32 = arith.constant 0 : i32
    %c0_i32_0 = arith.constant 0 : i32
    return %arg0, %c0_i32 : i32, i32
  }
  func.func @transform_1(%arg0: i32) -> (i32, i32) {
    %c0_i32 = arith.constant 0 : i32
    %c0_i32_0 = arith.constant 0 : i32
    return %arg0, %c0_i32 : i32, i32
  }
  func.func @transform_2(%arg0: i32) -> (i32, i32, i32) {
    %c0_i32 = arith.constant 0 : i32
    %c0_i32_0 = arith.constant 0 : i32
    %c0_i32_1 = arith.constant 0 : i32
    return %arg0, %c0_i32, %c0_i32_0 : i32, i32, i32
  }
}

</mosaic_0001>

<bundles_post_ra>
// kernel: tpu_custom_call.1
= control target key start
LH: loop header
LB: loop body
LE: loop exit
PB: predicated region body
PF: predicated region fallthrough
CT: control target
= control target key end

     0   :  { %7 = vsyncpa [#allocation3], 0  ;;  %s759_s0 = inlined_call_operand.vmem [shape: f32[50,10], index: 0, kind: input, shape index: {}]   ;;  %s760_s1 = inlined_call_operand.vmem [shape: f32[50,10], index: 1, kind: input, shape index: {}]   ;;  %s761_s2 = inlined_call_operand.hbm [shape: f32[4,2,10], index: 2, kind: output, shape index: {}]  }
   0x1   :  { %9 = vsyncpa [#allocation3 + $0x1], 0  ;;  %s629_s9 = smov 0   ;;  %s631_s10 = smov 0  }
   0x2   :  { %s633_s11 = smov 0   ;;  %s635_s12 = smov 0  }
   0x3 LB: > { %s650_s13 = sadd.s32 4294967295, %s610_s12   ;;  %s474_s14 = sadd.s32 4294967294, %s610_s12   ;;  %s610_s12 = sphi %s635_s12, %s767_s12   ;;  %s606_s11 = sphi %s633_s11, %s766_s11   ;;  %s602_s10 = sphi %s631_s10, %s765_s10   ;;  %s598_s9 = sphi %s629_s9, %s764_s9  }
   0x4   : > { %s654_s15 = sadd.s32 1, %s610_s12   ;;  %s74_s16 = sadd.s32 1, %s606_s11 }
   0x5   : > { %s71_s17 = ssub.s32 %s610_s12, %s654_s15  ;;  %p84_p0 = scmp.ne.s32.totalorder %s606_s11, %s602_s10 }
   0x6   : > { %p72_p1 = scmp.eq.s32.totalorder %s71_s17, 0  ;;  %p85_p2 = scmp.eq.s32.totalorder %s650_s13, 3 }
   0x7   : > { %p90_p3 = scmp.ne.s32.totalorder %s602_s10, %s598_s9  ;;  %p91_p4 = scmp.eq.s32.totalorder %s474_s14, 3 }
   0x8   : > { %s665_s18 = scalar_select %p72_p1, %s606_s11, %s74_s16  }
   0x9   : > { %p667_p5 = por %p85_p2, %p84_p0  ;;  %p671_p6 = por %p91_p4, %p90_p3 }
   0xa   : > { %p477_p7 = scmp.ge.s32.totalorder %s610_s12, 1  ;;  %p143_p8 = scmp.lt.s32.totalorder %s610_s12, 5 }
   0xc   : > { %p144_p9 = pnand %p477_p7, %p143_p8 }
   0xd   : > { %s678_s21 = sshll.u32 (!%p144_p9), %s650_s13, 1  ;;  %s485_s30 = sshll.u32 (!%p144_p9), %s650_s13, 4 }
   0xe   : > { %147 = sbr.rel (%p144_p9) target bundleno = 796 (0x31c), region = 28  ;;  %p183_p10 = scmp.lt.s32.totalorder (!%p144_p9), %s678_s21, 6 }
   0xf   : > { %s175_s3 = sand.u32 (!%p144_p9), 1, %s602_s10   ;;  %s398_s7 = scalar_lea.hbm (!%p144_p9), %s761_s2, %s678_s21 }
  0x10   : > { %s478_s4 = sshll.u32 (!%p144_p9), %s175_s3, 1  ;;  %s402_s14 = sshll.u32 (!%p144_p9), %s398_s7, 4  ;;  %s403_s14 = int_to_ptr.hbm [resolvable:$true] %s402_s14 }
  0x11   : > { %s177_s8 = scalar_lea.vmem (!%p144_p9), [#allocation2], %s478_s4  ;;  %s388_s16 = scalar_lea.sflag (!%p144_p9), [#allocation3], %s175_s3 }
  0x12   : > { %s400_s13 = sshll.u32 (!%p144_p9), %s177_s8, 4  ;;  %s562_s17 = sshra.s32 (!%p144_p9), %s403_s14, 4  ;;  %s401_s13 = int_to_ptr.vmem [resolvable:$true] %s400_s13  ;;  %s563_s17 = int_to_ptr.hbm [resolvable:$true] %s562_s17 }
  0x13   : > { %s184_s22 = scalar_select %p183_p10, %s678_s21, 6  ;;  %vm212_vm0 = vcmask 80896   ;;  %v210_v8 = vlaneseq  ;;  %v612_v52 = vmov 0.0   ;;  %v613_v61 = vmov 1.0  }
  0x14   : > { %vm326_vm10 = vcmask 7168   ;;  %vm361_vm14 = vcmask 130048   ;;  %vm385_vm15 = vcmask 74752   ;;  %s568_s21 = scalar_lea.hbm %s761_s2, 8  ;;  %p569_p0 = scmp.lt.s32.totalorder %s563_s17, %s761_s2 }
  0x15   : > { %s480_s23 = sshll.u32 %s184_s22, 3  ;;  %v699_v9 = vand.u32 127, %v210_v8  ;;  %s564_s22 = scalar_lea.hbm %s563_s17, 2 }
  0x16   : > { %s186_s26 = scalar_lea.vmem %s759_s0, %s480_s23  ;;  %s200_s29 = scalar_lea.vmem %s760_s1, %s480_s23 }
  0x17   : > { %v206_v0 = vld [vmem:[%s186_s26] sm:$0xff]  ;;  %v207_v4 = vld [vmem:[%s186_s26 + $0x8] sm:$0xff]  ;;  %p565_p11 = scmp.ne.s32.totalorder %s563_s17, %s564_s22  ;;  %p570_p1 = scmp.lt.s32.totalorder %s568_s21, %s564_s22 }
  0x18   : > { %v688_v1 = vld [vmem:[%s200_s29] sm:$0xff]  ;;  %v213_v2 = vsel %vm212_vm0, %v206_v0, -inf  ;;  %v216_v5 = vsel %vm212_vm0, %v207_v4, -inf  ;;  %v694_v6 = vld [vmem:[%s200_s29 + $0x8] sm:$0xff] }
  0x19   : > { %v273_v3 = vsel %vm212_vm0, %v688_v1, -inf  ;;  %214 = vmax.xlane.f32.xlu0 %v213_v2  ;;  %v276_v7 = vsel %vm212_vm0, %v694_v6, -inf  ;;  %p566_p12 = pnand %p565_p11, %p667_p5  ;;  %p571_p2 = por %p570_p1, %p569_p0 }
  0x1a   : > { %274 = vmax.xlane.f32.xlu2 %v273_v3  ;;  %v308_v3 = vshrl.u32 %v210_v8, 7 }
  0x1b   : > { %p567_p13 = pneg %p566_p12 }
  0x1d   : > { %p572_p3 = pnand %p571_p2, %p567_p13 }
  0x21   : > { %217 = vmax.xlane.f32.xlu0 %v216_v5 }
  0x22   : > { %277 = vmax.xlane.f32.xlu2 %v276_v7 }
  0x8c   : > { %v215_v10 = vpop.xlane.xlu0 %214 }
  0x8d   : > { %v701_v11 = vpop.xlane.xlu2 %274  ;;  %vm233_vm1 = vcmp.eq.f32.partialorder %v206_v0, %v215_v10  ;;  %v219_v29 = vsub.f32 %v206_v0, %v215_v10  ;;  %v309_v10 = vadd.s32 8, %v308_v3 }
  0x8e   : > { %v279_v12 = vsub.f32 %v688_v1, %v701_v11  ;;  %v235_v13 = vsel %vm233_vm1, %v699_v9, 10 }
  0x8f   : > { %v237_v14 = vsel %vm212_vm0, %v235_v13, 2147483647  ;;  %v221_v34 = vmul.f32 1.442695, %v219_v29 }
  0x90   : > { %v281_v15 = vmul.f32 1.442695, %v279_v12  ;;  %v239_v16 = vshra.s32 %v237_v14, 16  ;;  %v238_v28 = vand.u32 65535, %v237_v14 }
  0x92   : > { %v241_v17 = vcvt.s32.f32 %v239_v16  ;;  %536 = vpow2.f32 %v281_v15  ;;  %v240_v31 = vcvt.s32.f32 %v238_v28 }
  0x94   : > { %242 = vmin.xlane.f32.xlu1 %v241_v17  ;;  %v218_v18 = vpop.xlane.xlu0 %217 }
  0x95   : > { %vm234_vm2 = vcmp.eq.f32.partialorder %v207_v4, %v218_v18  ;;  %v710_v25 = vpop.xlane.xlu2 %277  ;;  %v220_v32 = vsub.f32 %v207_v4, %v218_v18 }
  0x96   : > { %v236_v19 = vsel %vm234_vm2, %v699_v9, 10  ;;  %v280_v26 = vsub.f32 %v694_v6, %v710_v25 }
  0x97   : > { %v252_v20 = vsel %vm212_vm0, %v236_v19, 2147483647  ;;  %v223_v37 = vmul.f32 1.442695, %v220_v32 }
  0x98   : > { %v537_v21 = vpop.eup %536  ;;  %v254_v22 = vshra.s32 %v252_v20, 16  ;;  %v283_v27 = vmul.f32 1.442695, %v280_v26  ;;  %v253_v35 = vand.u32 65535, %v252_v20 }
  0x99   : > { %v285_v23 = vsel %vm212_vm0, %v537_v21, 0.0 }
  0x9a   : > { %v256_v24 = vcvt.s32.f32 %v254_v22  ;;  %286 = vadd.xlane.f32.xlu2 %v285_v23  ;;  %538 = vpow2.f32 %v283_v27  ;;  %v255_v40 = vcvt.s32.f32 %v253_v35 }
  0x9b   : > { %540 = vpow2.f32 %v221_v34 }
  0x9c   : > { %257 = vmin.xlane.f32.xlu1 %v256_v24  ;;  %542 = vpow2.f32 %v223_v37 }
  0xa0   : > { %v539_v36 = vpop.eup %538 }
  0xa1   : > { %v288_v39 = vsel %vm212_vm0, %v539_v36, 0.0  ;;  %v541_v42 = vpop.eup %540 }
  0xa2   : > { %v543_v43 = vpop.eup %542  ;;  %v225_v44 = vsel %vm212_vm0, %v541_v42, 0.0 }
  0xa3   : > { %v228_v45 = vsel %vm212_vm0, %v543_v43, 0.0 }
 0x107   : > { %v243_v30 = vpop.xlane.xlu1 %242 }
 0x108   : > { %vm244_vm3 = vcmp.eq.f32.partialorder %v241_v17, %v243_v30  ;;  %v249_v46 = vcvt.f32.s32 %v243_v30 }
 0x109   : > { %v245_v33 = vsel %vm244_vm3, %v240_v31, inf }
 0x10a   : > { %246 = vmin.xlane.f32.xlu0 %v245_v33  ;;  %v250_v48 = vshll.u32 %v249_v46, 16 }
 0x10d   : > { %v287_v0 = vpop.xlane.xlu2 %286 }
 0x10e   : > { %544 = vlog2.f32 %v287_v0 }
 0x10f   : > { %v258_v38 = vpop.xlane.xlu1 %257 }
 0x110   : > { %vm259_vm4 = vcmp.eq.f32.partialorder %v256_v24, %v258_v38  ;;  %v264_v51 = vcvt.f32.s32 %v258_v38 }
 0x111   : > { %v260_v41 = vsel %vm259_vm4, %v255_v40, inf }
 0x112   : > { %289 = vadd.xlane.f32.xlu0 %v288_v39  ;;  %261 = vmin.xlane.f32.xlu1 %v260_v41  ;;  %v265_v56 = vshll.u32 %v264_v51, 16 }
 0x114   : > { %v545_v4 = vpop.eup %544 }
 0x11a   : > { %226 = vadd.xlane.f32.xlu1 %v225_v44  ;;  %229 = vadd.xlane.f32.xlu0 %v228_v45 }
 0x17d   : > { %v247_v47 = vpop.xlane.xlu0 %246 }
 0x17e   : > { %v248_v49 = vcvt.f32.s32 %v247_v47 }
 0x180   : > { %v251_v50 = vadd.s32 %v250_v48, %v248_v49 }
 0x182   : > { %vm267_vm5 = vcmp.eq.s32.totalorder %v699_v9, %v251_v50 }
 0x183   : > { %v483_v53 = vsel %vm267_vm5, 1.0, %v612_v52 }
 0x184   : > { %v297_v54 = vmul.f32 %v483_v53, %v688_v1  ;;  %v311_v1 = vstv %s485_s30 }
 0x185   : > { %v262_v55 = vpop.xlane.xlu1 %261  ;;  %v290_v2 = vpop.xlane.xlu0 %289  ;;  %v312_v5 = vadd.s32 %v311_v1, %v308_v3  ;;  %v313_v14 = vadd.s32 %v311_v1, %v309_v10 }
 0x186   : > { %v263_v57 = vcvt.f32.s32 %v262_v55  ;;  %v299_v58 = vsel %vm212_vm0, %v297_v54, 0.0  ;;  %546 = vlog2.f32 %v290_v2 }
 0x187   : > { %300 = vadd.xlane.f32.xlu2 %v299_v58  ;;  %vm314_vm7 = vcmp.lt.s32.totalorder %v312_v5, 50  ;;  %vm315_vm11 = vcmp.lt.s32.totalorder %v313_v14, 50 }
 0x188   : > { %v266_v59 = vadd.s32 %v265_v56, %v263_v57 }
 0x18a   : > { %vm268_vm6 = vcmp.eq.s32.totalorder %v699_v9, %v266_v59  ;;  %v292_v9 = vmul.f32 0.6931472, %v545_v4 }
 0x18b   : > { %v484_v60 = vsel %vm268_vm6, 1.0, %v612_v52  ;;  %488 = vmatpush.msk.msra.mxu0 %vm268_vm6, %v613_v61 }
 0x18c   : > { %v298_v62 = vmul.f32 %v484_v60, %v694_v6  ;;  %v295_v6 = vadd.f32 %v292_v9, %v701_v11  ;;  %v547_v12 = vpop.eup %546 }
 0x18d   : > { %489 = vmatpush.msk.msra.mxu0 %vm267_vm5, %v613_v61  ;;  %v227_v7 = vpop.xlane.xlu1 %226  ;;  %v230_v16 = vpop.xlane.xlu0 %229  ;;  %v294_v17 = vmul.f32 0.6931472, %v547_v12 }
 0x18e   : > { %v302_v63 = vsel %vm212_vm0, %v298_v62, 0.0  ;;  %vm231_vm8 = vcmp.lt.f32.partialorder %v227_v7, 5.0  ;;  %vm232_vm12 = vcmp.lt.f32.partialorder %v230_v16, 5.0 }
 0x18f   : > { %303 = vadd.xlane.f32.xlu1 %v302_v63  ;;  %vm318_vm9 = vmand %vm231_vm8, %vm314_vm7  ;;  %v296_v21 = vadd.f32 %v294_v17, %v710_v25 }
 0x190   : > { %v486_v18 = vsel %vm318_vm9, 1.0, %v612_v52  ;;  %vm319_vm13 = vmand %vm232_vm12, %vm315_vm11 }
 0x191   : > { %v487_v23 = vsel %vm319_vm13, 1.0, %v612_v52 }
 0x1fa   : > { %v301_v13 = vpop.xlane.xlu2 %300 }
 0x1fb   : > { %v305_v15 = vsub.f32 %v295_v6, %v301_v13 }
 0x1fd   : > { %v316_v19 = vsel %vm314_vm7, %v305_v15, 0.0 }
 0x1fe   : > { %v324_v8 = vmul.f32 %v486_v18, %v316_v19 }
 0x200   : > { %v327_v20 = vsel %vm326_vm10, %v486_v18, %v324_v8 }
 0x201   : > { %329 = vxpose.xlu2.b32.start [1/2] (short) (narrow) %v327_v20, 8 }
 0x202   : > { %v304_v11 = vpop.xlane.xlu1 %303 }
 0x203   : > { %v306_v22 = vsub.f32 %v296_v21, %v304_v11 }
 0x205   : > { %v317_v24 = vsel %vm315_vm11, %v306_v22, 0.0 }
 0x206   : > { %v325_v26 = vmul.f32 %v487_v23, %v317_v24 }
 0x208   : > { %v328_v27 = vsel %vm326_vm10, %v487_v23, %v325_v26 }
 0x209   : > { %330 = vxpose.xlu2.b32.end [2/2] (short) (narrow) %v328_v27, 8 }
 0x29a   : > { %v345_v28 = vpop.trf.xlu2 }
 0x29b   : > { %490 = vmatmul.msk.f32.vlgmr.msra.gmra.mxu0 %vm361_vm14, %v345_v28 }
 0x318   : > { %v382_v25 = vpop.f32.mrf.mxu0 }
 0x319   : > { %386 = vst.msk [vmem:[%s177_s8] sm:$0x3] %vm385_vm15, %v382_v25 }
 0x31a   : > { %575 = shalt.err (!%p572_p3)
}
 0x31b   : > { %495 = dma.vmem_to_hbm [thread:$0]  (%p667_p5), %s401_s13, 32, %s403_s14, %s388_s16  }
 0x31c PF: > { %p501_p4 = scmp.ge.s32.totalorder %s610_s12, 2  ;;  %s414_s27 = sand.u32 1, %s598_s9  }
 0x31d   : > { %s415_s28 = scalar_lea.sflag [#allocation3], %s414_s27 }
 0x31e   : > { %p498_p7 = pnand %p501_p4, %p671_p6 }
 0x320   : > { %p499_p8 = pneg %p498_p7 }
 0x322   : > { %593 = dma.done.wait (%p499_p8), %s415_s28, 32  }
 0x323   : > { %595 = vsyncadd (%p499_p8), %s415_s28, 4294967264  ;;  %p12_p9 = scmp.ge.s32.totalorder %s654_s15, 6   ;;  %s764_s9 = smov %s602_s10 }
 0x324   : > { %s765_s10 = smov %s606_s11  ;;  %s766_s11 = smov %s665_s18 }
 0x325   : > { %s767_s12 = smov %s654_s15  ;;  %14 = sbr.rel (!%p12_p9) target bundleno = 3 (0x3), region = 66 }
 0x32a   :  { %421 = vsyncpa [#allocation3], 1 }
 0x32b   :  { %423 = vsyncpa [#allocation3 + $0x1], 1 }

</bundles_post_ra>
